<compile_context>
chip_gen: v5e
topology: v5e:2x2
jax: 0.10.0
libtpu: 0.0.40
codegen_flags: <defaults>
</compile_context>

<pallas_src>
import jax
import jax.numpy as jnp
from jax.experimental import pallas as pl
from jax.experimental.pallas import tpu as pltpu


def _fma_linear_kernel(x_ref, w_ref, o_ref):
    """Generic tiny-K linear:  o = x @ w  with K unrolled on the VPU.

    x_ref: (R, K)   w_ref: (K, N)   o_ref: (R, N).   K is small & static
    (6 for the packed layout), so an unrolled multiply-add beats pushing a
    3-deep contraction through the MXU.
    """
    x = x_ref[...].astype(jnp.float32)   # (R, K)
    w = w_ref[...].astype(jnp.float32)   # (K, N)
    k_dim = w.shape[0]                   # static

    acc = x[:, 0:1] * w[0:1, :]          # (R,1) * (1,N) -> (R,N)
    for k in range(1, k_dim):            # static unroll
        acc = acc + x[:, k : k + 1] * w[k : k + 1, :]

    o_ref[...] = acc.astype(o_ref.dtype)


def make_linear_no_bias(w, *, tile_rows=4096, gridless_rows=8192):
    """Build a forward fn equivalent to nn.Linear(3, 64, bias=False).

    w: (out_features, in_features) in PyTorch nn.Linear layout.

    tile_rows      : rows (of the ORIGINAL x) per grid step on the tiled path.
    gridless_rows  : up to this many rows the whole problem runs as a single
                     gridless pallas_call with everything resident in VMEM.
    """
    w = jnp.asarray(w)
    n_out, k_in = w.shape                 # (64, 3)
    wt = w.T                              # (K, N) = (3, 64)

    # Lane-dense packing (done once, outside the hot path):
    #   packed x row r  = [x[2r, :], x[2r+1, :]]                 -> (B/2, 2K)
    #   packed out row r= [y[2r, :], y[2r+1, :]]                 -> (B/2, 2N)
    #   packed weight   = [[wt, 0], [0, wt]] (block diagonal)    -> (2K, 2N)
    zeros = jnp.zeros_like(wt)
    w_packed = jnp.concatenate(
        [
            jnp.concatenate([wt, zeros], axis=1),   # (K, 2N)
            jnp.concatenate([zeros, wt], axis=1),   # (K, 2N)
        ],
        axis=0,
    )                                               # (2K, 2N) = (6, 128)
    kp = 2 * k_in                                   # 6
    npk = 2 * n_out                                 # 128 -> fully lane-dense

    assert tile_rows % 2 == 0 and tile_rows >= 16

    def forward(x):
        b, k2 = x.shape
        assert k2 == k_in, f"expected in_features={k_in}, got {k2}"
        dtype = x.dtype

        # Pad to an even row count so (B,3)->(B/2,6) is a pure (free) reshape.
        b_pad = b + (b % 2)
        if b_pad != b:
            x = jnp.pad(x, ((0, 1), (0, 0)))
        rp = b_pad // 2                       # packed rows
        x2 = x.reshape(rp, kp)                # (B/2, 6), contiguous view

        if b_pad <= gridless_rows:
            # Small/medium batch: single gridless invocation, whole arrays in
            # VMEM (no grid / pipeline prologue-epilogue overhead).  Packed
            # footprint at the 8192-row cutoff is ~4 MiB -> fits every
            # generation's default scoped VMEM.
            out2 = pl.pallas_call(
                _fma_linear_kernel,
                out_shape=jax.ShapeDtypeStruct((rp, npk), dtype),
                in_specs=[
                    pl.BlockSpec(memory_space=pltpu.MemorySpace.VMEM),
                    pl.BlockSpec(memory_space=pltpu.MemorySpace.VMEM),
                ],
                out_specs=pl.BlockSpec(memory_space=pltpu.MemorySpace.VMEM),
            )(x2, w_packed)
        else:
            # Large batch: tile the (packed) batch dimension.  The op is
            # HBM-bound (~1.4 flop/byte), so big row tiles + dense 128-lane
            # stores are the whole game; the weight block is index-invariant
            # and stays VMEM-resident across steps.
            tp = tile_rows // 2               # packed rows per grid step
            n_steps = pl.cdiv(rp, tp)

            if n_steps >= 8:
                # Deep enough grid: keep a third input buffer in flight.
                x_spec = pl.BlockSpec(
                    (tp, kp), lambda i: (i, 0), pipeline_mode=pl.Buffered(3)
                )
            else:
                x_spec = pl.BlockSpec((tp, kp), lambda i: (i, 0))

            out2 = pl.pallas_call(
                _fma_linear_kernel,
                out_shape=jax.ShapeDtypeStruct((rp, npk), dtype),
                grid=(n_steps,),
                in_specs=[
                    x_spec,
                    pl.BlockSpec((kp, npk), lambda i: (0, 0)),   # resident
                ],
                out_specs=pl.BlockSpec((tp, npk), lambda i: (i, 0)),
                compiler_params=pltpu.CompilerParams(
                    # Batch tiles are independent.
                    dimension_semantics=("parallel",),
                    # Explicit budget: portable across v5e's 16 MiB scoped
                    # default and v7x's 64 MiB physical VMEM.
                    vmem_limit_bytes=32 * 1024 * 1024,
                ),
            )(x2, w_packed)

        out = out2.reshape(b_pad, n_out)      # free reshape back to (B, 64)
        if b_pad != b:
            out = out[:b]
        return out

    return forward


if __name__ == "__main__":
    key = jax.random.PRNGKey(0)
    kw, kx1, kx2, kx3 = jax.random.split(key, 4)

    IN_F, OUT_F = 3, 64

    # Deterministic synthetic init (nn.Linear default: U(-1/sqrt(in), 1/sqrt(in))).
    bound = 1.0 / (float(IN_F) ** 0.5)
    w = jax.random.uniform(kw, (OUT_F, IN_F), jnp.float32, -bound, bound)

    # Default-config forward (gridless path for these sizes).
    fwd = jax.jit(make_linear_no_bias(w))

    # 1) Small even batch (primary check).
    x_small = jax.random.normal(kx1, (8, IN_F), jnp.float32)
    out_small = jax.block_until_ready(fwd(x_small))
    ref_small = x_small @ w.T
    assert out_small.shape == (8, OUT_F)
    assert jnp.allclose(out_small, ref_small, atol=1e-5, rtol=1e-5)

    # 2) Odd batch exercises the pad-to-even packing path.
    x_odd = jax.random.normal(kx2, (7, IN_F), jnp.float32)
    out_odd = jax.block_until_ready(fwd(x_odd))
    ref_odd = x_odd @ w.T
    assert out_odd.shape == (7, OUT_F)
    assert jnp.allclose(out_odd, ref_odd, atol=1e-5, rtol=1e-5)

    # 3) Tiled path with a ragged last tile, odd batch, and >=8 grid steps
    #    (exercises Buffered(3) + masked last-tile writeback) using small
    #    test-only tile/cutoff knobs so shapes stay modest.
    fwd_tiled = jax.jit(make_linear_no_bias(w, tile_rows=256, gridless_rows=512))
    x_big = jax.random.normal(kx3, (2051, IN_F), jnp.float32)
    out_big = jax.block_until_ready(fwd_tiled(x_big))
    ref_big = x_big @ w.T
    assert out_big.shape == (2051, OUT_F)
    assert jnp.allclose(out_big, ref_big, atol=1e-5, rtol=1e-5)

    print("KERNEL_OK")
</pallas_src>

<mosaic_0001>
module attributes {stable_mosaic.version = 11 : i64} {
  func.func @_fma_linear_kernel(%arg0: memref<4x6xf32, #tpu.memory_space<vmem>>, %arg1: memref<6x128xf32, #tpu.memory_space<vmem>>, %arg2: memref<4x128xf32, #tpu.memory_space<vmem>>) attributes {dimension_semantics = [], scalar_prefetch = 0 : i64, scratch_operands = 0 : i64, tpu.core_type = #tpu.core_type<tc>} {
    %c0 = arith.constant 0 : index
    %c0_0 = arith.constant 0 : index
    %0 = vector.load %arg0[%c0, %c0_0] : memref<4x6xf32, #tpu.memory_space<vmem>>, vector<4x6xf32>
    %c0_1 = arith.constant 0 : index
    %c0_2 = arith.constant 0 : index
    %1 = vector.load %arg1[%c0_1, %c0_2] : memref<6x128xf32, #tpu.memory_space<vmem>>, vector<6x128xf32>
    %2 = vector.extract_strided_slice %0 {offsets = [0, 0], sizes = [4, 1], strides = [1, 1]} : vector<4x6xf32> to vector<4x1xf32>
    %3 = vector.extract_strided_slice %1 {offsets = [0, 0], sizes = [1, 128], strides = [1, 1]} : vector<6x128xf32> to vector<1x128xf32>
    %4 = vector.broadcast %2 : vector<4x1xf32> to vector<4x128xf32>
    %5 = vector.broadcast %3 : vector<1x128xf32> to vector<4x128xf32>
    %6 = arith.mulf %4, %5 : vector<4x128xf32>
    %7 = vector.extract_strided_slice %0 {offsets = [0, 1], sizes = [4, 1], strides = [1, 1]} : vector<4x6xf32> to vector<4x1xf32>
    %8 = vector.extract_strided_slice %1 {offsets = [1, 0], sizes = [1, 128], strides = [1, 1]} : vector<6x128xf32> to vector<1x128xf32>
    %9 = vector.broadcast %7 : vector<4x1xf32> to vector<4x128xf32>
    %10 = vector.broadcast %8 : vector<1x128xf32> to vector<4x128xf32>
    %11 = arith.mulf %9, %10 : vector<4x128xf32>
    %12 = arith.addf %6, %11 : vector<4x128xf32>
    %13 = vector.extract_strided_slice %0 {offsets = [0, 2], sizes = [4, 1], strides = [1, 1]} : vector<4x6xf32> to vector<4x1xf32>
    %14 = vector.extract_strided_slice %1 {offsets = [2, 0], sizes = [1, 128], strides = [1, 1]} : vector<6x128xf32> to vector<1x128xf32>
    %15 = vector.broadcast %13 : vector<4x1xf32> to vector<4x128xf32>
    %16 = vector.broadcast %14 : vector<1x128xf32> to vector<4x128xf32>
    %17 = arith.mulf %15, %16 : vector<4x128xf32>
    %18 = arith.addf %12, %17 : vector<4x128xf32>
    %19 = vector.extract_strided_slice %0 {offsets = [0, 3], sizes = [4, 1], strides = [1, 1]} : vector<4x6xf32> to vector<4x1xf32>
    %20 = vector.extract_strided_slice %1 {offsets = [3, 0], sizes = [1, 128], strides = [1, 1]} : vector<6x128xf32> to vector<1x128xf32>
    %21 = vector.broadcast %19 : vector<4x1xf32> to vector<4x128xf32>
    %22 = vector.broadcast %20 : vector<1x128xf32> to vector<4x128xf32>
    %23 = arith.mulf %21, %22 : vector<4x128xf32>
    %24 = arith.addf %18, %23 : vector<4x128xf32>
    %25 = vector.extract_strided_slice %0 {offsets = [0, 4], sizes = [4, 1], strides = [1, 1]} : vector<4x6xf32> to vector<4x1xf32>
    %26 = vector.extract_strided_slice %1 {offsets = [4, 0], sizes = [1, 128], strides = [1, 1]} : vector<6x128xf32> to vector<1x128xf32>
    %27 = vector.broadcast %25 : vector<4x1xf32> to vector<4x128xf32>
    %28 = vector.broadcast %26 : vector<1x128xf32> to vector<4x128xf32>
    %29 = arith.mulf %27, %28 : vector<4x128xf32>
    %30 = arith.addf %24, %29 : vector<4x128xf32>
    %31 = vector.extract_strided_slice %0 {offsets = [0, 5], sizes = [4, 1], strides = [1, 1]} : vector<4x6xf32> to vector<4x1xf32>
    %32 = vector.extract_strided_slice %1 {offsets = [5, 0], sizes = [1, 128], strides = [1, 1]} : vector<6x128xf32> to vector<1x128xf32>
    %33 = vector.broadcast %31 : vector<4x1xf32> to vector<4x128xf32>
    %34 = vector.broadcast %32 : vector<1x128xf32> to vector<4x128xf32>
    %35 = arith.mulf %33, %34 : vector<4x128xf32>
    %36 = arith.addf %30, %35 : vector<4x128xf32>
    %c0_3 = arith.constant 0 : index
    %c0_4 = arith.constant 0 : index
    %37 = vector.load %arg2[%c0_3, %c0_4] : memref<4x128xf32, #tpu.memory_space<vmem>>, vector<4x128xf32>
    tpu.vector_store %arg2[%c0_3, %c0_4], %36 {strides = array<i32>} : memref<4x128xf32, #tpu.memory_space<vmem>>, vector<4x128xf32>,
    return
  }
}

</mosaic_0001>

<bundles_post_ra>
// kernel: forward.1
= control target key start
LH: loop header
LB: loop body
LE: loop exit
PB: predicated region body
PF: predicated region fallthrough
CT: control target
= control target key end

     0   :  { %v73_v0 = vmov 0   ;;  %v74_v2 = vmov 2   ;;  %v75_v3 = vmov 4   ;;  %v76_v4 = vmov 1   ;;  %s103_s0 = inlined_call_operand.vmem [shape: f32[4,6], index: 0, kind: input, shape index: {}]   ;;  %s104_s1 = inlined_call_operand.vmem [shape: f32[6,128], index: 1, kind: input, shape index: {}]   ;;  %s105_s2 = inlined_call_operand.vmem [shape: f32[4,128], index: 2, kind: output, shape index: {}]  }
   0x1   :  { %66 = vset.pattern.permute.xlu0 %v73_v0  ;;  %v11_v1 = vld [vmem:[%s103_s0] sm:$0xf]  ;;  %68 = vset.pattern.permute.xlu1 %v74_v2  ;;  %v77_v5 = vmov 3   ;;  %v78_v6 = vmov 5  }
   0x2   :  { %15 = vperm.xlu0 %66, %v11_v1   ;;  %28 = vperm.xlu1 %68, %v11_v1   ;;  %v12_v9 = vld [vmem:[%s104_s1] sm:$0x3f] }
   0x3   :  { %70 = vset.pattern.permute.xlu2 %v75_v3  ;;  %v18_v11 = vperm.slane %v12_v9, 0  ;;  %v24_v12 = vperm.slane %v12_v9, 1  ;;  %v31_v13 = vperm.slane %v12_v9, 2  ;;  %v38_v14 = vperm.slane %v12_v9, 3 }
   0x4   :  { %42 = vperm.xlu2 %70, %v11_v1   ;;  %v45_v19 = vperm.slane %v12_v9, 4  ;;  %v52_v23 = vperm.slane %v12_v9, 5 }
   0xa   :  { %67 = vset.pattern.permute.xlu0 %v76_v4  ;;  %69 = vset.pattern.permute.xlu1 %v77_v5 }
   0xb   :  { %21 = vperm.xlu0 %67, %v11_v1   ;;  %35 = vperm.xlu1 %69, %v11_v1  }
   0xc   :  { %71 = vset.pattern.permute.xlu2 %v78_v6 }
   0xd   :  { %49 = vperm.xlu2 %71, %v11_v1  }
  0x13   :  { %72 = vset.pattern.permute.xlu0 %v78_v6 }
  0x5e   :  { %v43_v10 = vpop.permute.xlu2 %42 }
  0x5f   :  { %v46_v26 = vmul.f32 %v45_v19, %v43_v10 }
  0x67   :  { %v50_v24 = vpop.permute.xlu2 %49 }
  0x68   :  { %v53_v28 = vmul.f32 %v52_v23, %v50_v24 }
  0x74   :  { %v16_v7 = vpop.permute.xlu0 %15  ;;  %v29_v8 = vpop.permute.xlu1 %28 }
  0x75   :  { %v19_v17 = vmul.f32 %v18_v11, %v16_v7  ;;  %v32_v20 = vmul.f32 %v31_v13, %v29_v8 }
  0x7d   :  { %v22_v15 = vpop.permute.xlu0 %21  ;;  %v36_v16 = vpop.permute.xlu1 %35 }
  0x7e   :  { %v25_v18 = vmul.f32 %v24_v12, %v22_v15  ;;  %v39_v22 = vmul.f32 %v38_v14, %v36_v16 }
  0x80   :  { %v26_v21 = vadd.f32 %v25_v18, %v19_v17 }
  0x82   :  { %v33_v25 = vadd.f32 %v32_v20, %v26_v21 }
  0x84   :  { %v40_v27 = vadd.f32 %v39_v22, %v33_v25 }
  0x86   :  { %v47_v29 = vadd.f32 %v46_v26, %v40_v27 }
  0x88   :  { %v54_v30 = vadd.f32 %v53_v28, %v47_v29 }
  0x8a   :  { %55 = vst [vmem:[%s105_s2] sm:$0xf] %v54_v30 }

</bundles_post_ra>
